<compile_context>
chip_gen: v7x
topology: tpu7x:2x2x1
jax: 0.10.0
libtpu: 0.0.40
codegen_flags: <defaults>
</compile_context>

<pallas_src>
import functools

import jax
import jax.numpy as jnp
from jax.experimental import pallas as pl
from jax.experimental.pallas import tpu as pltpu


def _round_up(x, m):
    return ((x + m - 1) // m) * m


def _topk_acc_kernel(labels_ref, sim_true_ref, pred_ref, lab_ref,
                     count_ref, rank_ref, *,
                     k, total_b, total_l, tile_b, tile_l):
    i = pl.program_id(0)          # batch tile
    l = pl.program_id(1)          # label tile (innermost, reduction axis)

    @pl.when(l == 0)
    def _():
        rank_ref[...] = jnp.zeros_like(rank_ref)

    # MXU matmul with canonical layout: (tile_b, D) x (D, tile_l) -> f32.
    sim = jax.lax.dot_general(
        pred_ref[...], lab_ref[...],
        dimension_numbers=(((1,), (0,)), ((), ())),
        preferred_element_type=jnp.float32)                    # (tile_b, tile_l)

    labels = labels_ref[...]                                   # (tile_b, 1) int32
    sim_true = sim_true_ref[...]                               # (tile_b, 1) f32

    # Global column (label) index of every lane of this tile.
    col = jax.lax.broadcasted_iota(jnp.int32, sim.shape, 1) + l * tile_l

    # Rank under descending sort with lowest-index-first tie-break.  The true
    # column itself is excluded explicitly so a tiny numeric difference between
    # the wrapper-computed sim_true and the MXU sim cannot inflate the rank.
    better = (sim > sim_true) | ((sim == sim_true) & (col < labels))
    counted = better & (col != labels)
    if total_l % tile_l != 0:          # static: mask padded label columns
        counted = counted & (col < total_l)

    rank_ref[...] += jnp.sum(counted.astype(jnp.int32), axis=1, keepdims=True)

    @pl.when(l == pl.num_programs(1) - 1)
    def _():
        row = jax.lax.broadcasted_iota(jnp.int32, labels.shape, 0) + i * tile_b
        valid = (row < total_b) & (labels >= 0) & (labels < total_l)
        correct = jnp.where(valid & (rank_ref[...] < k), 1.0, 0.0)
        count = jnp.sum(correct)
        # Lane-dense per-tile partial output (replicated count, unmasked vst).
        count_ref[...] = jnp.full(count_ref.shape, count, dtype=jnp.float32)


def topk_horizon_accuracy(predicted_embeddings, label_embeddings, true_labels,
                          k=5, tile_b=None, tile_l=None):
    """predicted_embeddings: (B, D); label_embeddings: (L, D);
    true_labels: (B,) int; returns scalar accuracy (f32)."""
    B, D = predicted_embeddings.shape
    L, _ = label_embeddings.shape

    # Batch tile: 256 rows (v6e/v7x MXU width), multiple of 16 for bf16 packing.
    if tile_b is None:
        tile_b = min(256, _round_up(B, 16))
    tile_b = _round_up(tile_b, 16)
    # Label tile: lane-dim multiple of 128.
    if tile_l is None:
        tile_l = min(512, _round_up(L, 128))
    tile_l = _round_up(tile_l, 128)

    b_pad = _round_up(B, tile_b)
    l_pad = _round_up(L, tile_l)
    nb = b_pad // tile_b
    nl = l_pad // tile_l

    # bf16 inputs, f32 accumulation (review: MXU runs ~3-4x faster than f32).
    pred = predicted_embeddings.astype(jnp.bfloat16)
    lab = label_embeddings.astype(jnp.bfloat16)
    labels = true_labels.astype(jnp.int32)

    if b_pad != B:
        pred = jnp.pad(pred, ((0, b_pad - B), (0, 0)))
        labels = jnp.pad(labels, (0, b_pad - B), constant_values=-1)

    # sim_true per row (take + row-wise dot, f32 accumulation) computed once in
    # the wrapper instead of a masked max over L inside every kernel tile.
    gathered = jnp.take(lab, jnp.clip(labels, 0, L - 1), axis=0)     # (b_pad, D)
    sim_true = jnp.einsum('bd,bd->b', pred, gathered,
                          preferred_element_type=jnp.float32)        # (b_pad,)
    labels_2d = labels.reshape(b_pad, 1)
    sim_true_2d = sim_true.reshape(b_pad, 1)

    # Pre-transposed, L-padded label matrix: canonical (D, L) rhs for the MXU.
    lab_t = lab.T
    if l_pad != L:
        lab_t = jnp.pad(lab_t, ((0, 0), (0, l_pad - L)))

    kernel = functools.partial(_topk_acc_kernel, k=k, total_b=B, total_l=L,
                               tile_b=tile_b, tile_l=tile_l)

    grid_spec = pltpu.PrefetchScalarGridSpec(
        num_scalar_prefetch=0,
        grid=(nb, nl),
        in_specs=[
            pl.BlockSpec((tile_b, 1), lambda i, l: (i, 0)),    # true labels
            pl.BlockSpec((tile_b, 1), lambda i, l: (i, 0)),    # sim of true label
            pl.BlockSpec((tile_b, D), lambda i, l: (i, 0)),    # predicted (bf16)
            pl.BlockSpec((D, tile_l), lambda i, l: (0, l)),    # labels^T (bf16)
        ],
        out_specs=pl.BlockSpec((8, 128), lambda i, l: (i, 0)),
        scratch_shapes=[pltpu.VMEM((tile_b, 1), jnp.int32)],   # rank accumulator
    )

    # Generation-aware VMEM limit: actual buffer budget, capped below physical.
    est = (2 * tile_b * D * 2            # pred tiles (bf16, double-buffered)
           + 2 * D * tile_l * 2          # label tiles (bf16, double-buffered)
           + 4 * tile_b * 128 * 4        # labels + sim_true (lane-padded)
           + 2 * 8 * 128 * 4             # output slabs
           + tile_b * 128 * 4            # rank scratch (lane-padded)
           + 6 * tile_b * tile_l * 4)    # sim / mask intermediates headroom
    try:
        vmem_cap = pltpu.get_tpu_info().vmem_capacity_bytes
    except Exception:
        vmem_cap = 64 * 1024 * 1024
    vmem_limit = int(min(max(2 * est, 16 * 1024 * 1024), vmem_cap * 3 // 4))

    out = pl.pallas_call(
        kernel,
        out_shape=jax.ShapeDtypeStruct((nb * 8, 128), jnp.float32),
        grid_spec=grid_spec,
        compiler_params=pltpu.CompilerParams(
            dimension_semantics=("parallel", "arbitrary"),
            vmem_limit_bytes=vmem_limit),
    )(labels_2d, sim_true_2d, pred, lab_t)

    # Each batch tile wrote its partial count replicated over an (8, 128) slab.
    counts = out.reshape(nb, 8, 128)[:, 0, 0]                        # (nb,)
    return jnp.sum(counts) / jnp.float32(B)


def _reference(predicted_embeddings, label_embeddings, true_labels, k=5):
    sim = predicted_embeddings @ label_embeddings.T
    _, top_idx = jax.lax.top_k(sim, k)
    correct = jnp.any(top_idx == true_labels[:, None], axis=1)
    return jnp.mean(correct.astype(jnp.float32))


if __name__ == "__main__":
    key = jax.random.PRNGKey(0)
    k_pred, k_lab, k_true = jax.random.split(key, 3)

    B, D, L, K = 8, 32, 16, 5   # batch, embedding_dim, num_labels, top-k

    predicted = jax.random.normal(k_pred, (B, D), dtype=jnp.float32)
    # Deterministic "fixed label embedding matrix" (module __init__ argument).
    label_embeddings = jax.random.normal(k_lab, (L, D), dtype=jnp.float32)
    true_labels = jax.random.randint(k_true, (B,), 0, L, dtype=jnp.int32)

    acc = topk_horizon_accuracy(predicted, label_embeddings, true_labels, k=K)
    acc = jax.block_until_ready(acc)

    # Reference on the same bf16-rounded inputs (kernel uses bf16 in / f32 acc).
    ref = _reference(predicted.astype(jnp.bfloat16).astype(jnp.float32),
                     label_embeddings.astype(jnp.bfloat16).astype(jnp.float32),
                     true_labels, k=K)
    assert abs(float(acc) - float(ref)) < 1e-6, (float(acc), float(ref))

    print("KERNEL_OK")
</pallas_src>

<mosaic_0001>
module attributes {stable_mosaic.version = 11 : i64} {
  func.func @_topk_acc_kernel(%arg0: i32, %arg1: i32, %arg2: memref<16x1xi32, #tpu.memory_space<vmem>>, %arg3: memref<16x1xf32, #tpu.memory_space<vmem>>, %arg4: memref<16x32xbf16, #tpu.memory_space<vmem>>, %arg5: memref<32x128xbf16, #tpu.memory_space<vmem>>, %arg6: memref<8x128xf32, #tpu.memory_space<vmem>>, %arg7: memref<16x1xi32, #tpu.memory_space<vmem>>) attributes {dimension_semantics = [#tpu.dimension_semantics<parallel>, #tpu.dimension_semantics<arbitrary>], iteration_bounds = array<i64: 1, 1>, scalar_prefetch = 0 : i64, scratch_operands = 1 : i64, tpu.core_type = #tpu.core_type<tc>, window_params = [{transform_indices = @transform_0, window_bounds = array<i64: 16, 1>}, {transform_indices = @transform_1, window_bounds = array<i64: 16, 1>}, {transform_indices = @transform_2, window_bounds = array<i64: 16, 32>}, {transform_indices = @transform_3, window_bounds = array<i64: 32, 128>}, {transform_indices = @transform_4, window_bounds = array<i64: 8, 128>}]} {
    %c0_i32 = arith.constant 0 : i32
    %0 = arith.cmpi eq, %arg1, %c0_i32 : i32
    %1 = arith.extui %0 : i1 to i32
    %c0_i32_0 = arith.constant 0 : i32
    %2 = arith.cmpi ne, %1, %c0_i32_0 : i32
    scf.if %2 {
      %c0_i32_15 = arith.constant 0 : i32
      %35 = vector.broadcast %c0_i32_15 : i32 to vector<16x1xi32>
      %c0_16 = arith.constant 0 : index
      %c0_17 = arith.constant 0 : index
      %36 = vector.load %arg7[%c0_16, %c0_17] : memref<16x1xi32, #tpu.memory_space<vmem>>, vector<16x1xi32>
      tpu.vector_store %arg7[%c0_16, %c0_17], %35 {strides = array<i32>} : memref<16x1xi32, #tpu.memory_space<vmem>>, vector<16x1xi32>,
    } else {
    }
    %c0 = arith.constant 0 : index
    %c0_1 = arith.constant 0 : index
    %3 = vector.load %arg4[%c0, %c0_1] : memref<16x32xbf16, #tpu.memory_space<vmem>>, vector<16x32xbf16>
    %c0_2 = arith.constant 0 : index
    %c0_3 = arith.constant 0 : index
    %4 = vector.load %arg5[%c0_2, %c0_3] : memref<32x128xbf16, #tpu.memory_space<vmem>>, vector<32x128xbf16>
    %cst = arith.constant dense<0.000000e+00> : vector<16x128xf32>
    %5 = tpu.matmul %3, %4, %cst {dimension_numbers = #tpu.dot_dimension_numbers<[1], [0], [0], [1], [0, 0, 1, 1], [], []>} : vector<16x32xbf16>, vector<32x128xbf16>, vector<16x128xf32> -> vector<16x128xf32>
    %c0_4 = arith.constant 0 : index
    %c0_5 = arith.constant 0 : index
    %6 = vector.load %arg2[%c0_4, %c0_5] : memref<16x1xi32, #tpu.memory_space<vmem>>, vector<16x1xi32>
    %c0_6 = arith.constant 0 : index
    %c0_7 = arith.constant 0 : index
    %7 = vector.load %arg3[%c0_6, %c0_7] : memref<16x1xf32, #tpu.memory_space<vmem>>, vector<16x1xf32>
    %8 = tpu.iota {dimensions = array<i32: 1>} : vector<16x128xi32>
    %c128_i32 = arith.constant 128 : i32
    %9 = arith.muli %arg1, %c128_i32 : i32
    %10 = vector.broadcast %9 : i32 to vector<16x128xi32>
    %11 = arith.addi %8, %10 : vector<16x128xi32>
    %12 = vector.broadcast %7 : vector<16x1xf32> to vector<16x128xf32>
    %13 = arith.cmpf ogt, %5, %12 : vector<16x128xf32>
    %14 = vector.broadcast %7 : vector<16x1xf32> to vector<16x128xf32>
    %15 = arith.cmpf oeq, %5, %14 : vector<16x128xf32>
    %16 = vector.broadcast %6 : vector<16x1xi32> to vector<16x128xi32>
    %17 = arith.cmpi slt, %11, %16 : vector<16x128xi32>
    %18 = arith.andi %15, %17 : vector<16x128xi1>
    %19 = arith.ori %13, %18 : vector<16x128xi1>
    %20 = vector.broadcast %6 : vector<16x1xi32> to vector<16x128xi32>
    %21 = arith.cmpi ne, %11, %20 : vector<16x128xi32>
    %22 = arith.andi %19, %21 : vector<16x128xi1>
    %c16_i32 = arith.constant 16 : i32
    %23 = vector.broadcast %c16_i32 : i32 to vector<16x128xi32>
    %24 = arith.cmpi slt, %11, %23 : vector<16x128xi32>
    %25 = arith.andi %22, %24 : vector<16x128xi1>
    %c0_8 = arith.constant 0 : index
    %c0_9 = arith.constant 0 : index
    %26 = vector.load %arg7[%c0_8, %c0_9] : memref<16x1xi32, #tpu.memory_space<vmem>>, vector<16x1xi32>
    %27 = arith.extui %25 : vector<16x128xi1> to vector<16x128xi32>
    %cst_10 = arith.constant dense<0> : vector<16xi32>
    %28 = vector.multi_reduction <add>, %27, %cst_10 [1] : vector<16x128xi32> to vector<16xi32>
    %29 = vector.shape_cast %28 : vector<16xi32> to vector<16x1xi32>
    %30 = arith.addi %26, %29 : vector<16x1xi32>
    %c0_11 = arith.constant 0 : index
    %c0_12 = arith.constant 0 : index
    %31 = vector.load %arg7[%c0_11, %c0_12] : memref<16x1xi32, #tpu.memory_space<vmem>>, vector<16x1xi32>
    tpu.vector_store %arg7[%c0_11, %c0_12], %30 {strides = array<i32>} : memref<16x1xi32, #tpu.memory_space<vmem>>, vector<16x1xi32>,
    %c0_i32_13 = arith.constant 0 : i32
    %32 = arith.cmpi eq, %arg1, %c0_i32_13 : i32
    %33 = arith.extui %32 : i1 to i32
    %c0_i32_14 = arith.constant 0 : i32
    %34 = arith.cmpi ne, %33, %c0_i32_14 : i32
    scf.if %34 {
      %35 = tpu.iota {dimensions = array<i32: 0>} : vector<16x1xi32>
      %c16_i32_15 = arith.constant 16 : i32
      %36 = arith.muli %arg0, %c16_i32_15 : i32
      %37 = vector.broadcast %36 : i32 to vector<16x1xi32>
      %38 = arith.addi %35, %37 : vector<16x1xi32>
      %c8_i32 = arith.constant 8 : i32
      %39 = vector.broadcast %c8_i32 : i32 to vector<16x1xi32>
      %40 = arith.cmpi slt, %38, %39 : vector<16x1xi32>
      %c0_i32_16 = arith.constant 0 : i32
      %41 = vector.broadcast %c0_i32_16 : i32 to vector<16x1xi32>
      %42 = arith.cmpi sge, %6, %41 : vector<16x1xi32>
      %43 = arith.andi %40, %42 : vector<16x1xi1>
      %c16_i32_17 = arith.constant 16 : i32
      %44 = vector.broadcast %c16_i32_17 : i32 to vector<16x1xi32>
      %45 = arith.cmpi slt, %6, %44 : vector<16x1xi32>
      %46 = arith.andi %43, %45 : vector<16x1xi1>
      %c0_18 = arith.constant 0 : index
      %c0_19 = arith.constant 0 : index
      %47 = vector.load %arg7[%c0_18, %c0_19] : memref<16x1xi32, #tpu.memory_space<vmem>>, vector<16x1xi32>
      %c5_i32 = arith.constant 5 : i32
      %48 = vector.broadcast %c5_i32 : i32 to vector<16x1xi32>
      %49 = arith.cmpi slt, %47, %48 : vector<16x1xi32>
      %50 = arith.andi %46, %49 : vector<16x1xi1>
      %cst_20 = arith.constant 1.000000e+00 : f32
      %cst_21 = arith.constant 0.000000e+00 : f32
      %51 = vector.broadcast %cst_20 : f32 to vector<16x1xf32>
      %52 = vector.broadcast %cst_21 : f32 to vector<16x1xf32>
      %53 = arith.select %50, %51, %52 : vector<16x1xi1>, vector<16x1xf32>
      %54 = vector.shape_cast %53 : vector<16x1xf32> to vector<1x16x1xf32>
      %cst_22 = arith.constant dense<0.000000e+00> : vector<1xf32>
      %55 = vector.multi_reduction <add>, %54, %cst_22 [1, 2] : vector<1x16x1xf32> to vector<1xf32>
      %56 = vector.shape_cast %55 : vector<1xf32> to vector<1x1x1xf32>
      %57 = vector.extract %56[0, 0, 0] : f32 from vector<1x1x1xf32>
      %58 = vector.broadcast %57 : f32 to vector<8x128xf32>
      %c0_23 = arith.constant 0 : index
      %c0_24 = arith.constant 0 : index
      %59 = vector.load %arg6[%c0_23, %c0_24] : memref<8x128xf32, #tpu.memory_space<vmem>>, vector<8x128xf32>
      tpu.vector_store %arg6[%c0_23, %c0_24], %58 {strides = array<i32>} : memref<8x128xf32, #tpu.memory_space<vmem>>, vector<8x128xf32>,
    } else {
    }
    return
  }
  func.func @transform_0(%arg0: i32, %arg1: i32) -> (i32, i32) {
    %c0_i32 = arith.constant 0 : i32
    %c0_i32_0 = arith.constant 0 : i32
    return %arg0, %c0_i32 : i32, i32
  }
  func.func @transform_1(%arg0: i32, %arg1: i32) -> (i32, i32) {
    %c0_i32 = arith.constant 0 : i32
    %c0_i32_0 = arith.constant 0 : i32
    return %arg0, %c0_i32 : i32, i32
  }
  func.func @transform_2(%arg0: i32, %arg1: i32) -> (i32, i32) {
    %c0_i32 = arith.constant 0 : i32
    %c0_i32_0 = arith.constant 0 : i32
    return %arg0, %c0_i32 : i32, i32
  }
  func.func @transform_3(%arg0: i32, %arg1: i32) -> (i32, i32) {
    %c0_i32 = arith.constant 0 : i32
    %c0_i32_0 = arith.constant 0 : i32
    return %c0_i32, %arg1 : i32, i32
  }
  func.func @transform_4(%arg0: i32, %arg1: i32) -> (i32, i32) {
    %c0_i32 = arith.constant 0 : i32
    %c0_i32_0 = arith.constant 0 : i32
    return %arg0, %c0_i32 : i32, i32
  }
}

</mosaic_0001>

<bundles_post_ra>
// kernel: tpu_custom_call.1
= control target key start
LH: loop header
LB: loop body
LE: loop exit
PB: predicated region body
PF: predicated region fallthrough
CT: control target
= control target key end

     0   :  { %v275_v1 = vmov 0.0   ;;  %vm276_vm0 = vmmov 0   ;;  %v277_v4 = vmov 0   ;;  %s354_s0 = inlined_call_operand.vmem [shape: s32[16,1], index: 0, kind: input, shape index: {}]   ;;  %s355_s1 = inlined_call_operand.vmem [shape: f32[16,1], index: 1, kind: input, shape index: {}]   ;;  %s356_s2 = inlined_call_operand.vmem [shape: bf16[16,32], index: 2, kind: input, shape index: {}]   ;;  %s357_s3 = inlined_call_operand.vmem [shape: bf16[32,128], index: 3, kind: input, shape index: {}]   ;;  %s358_s4 = inlined_call_operand.hbm [shape: f32[8,128], index: 4, kind: output, shape index: {}]  }
   0x1   :  { %v248_v0 = vld [vmem:[%s357_s3] sm:$0xff]   ;;  %232 = vmatprep.subr.bf16.mxu0 %v275_v1  ;;  %v249_v2 = vld [vmem:[%s357_s3 + $0x8] sm:$0xff]   ;;  %236 = vmatprep.mubr.msk.bf16.mxu0 %vm276_vm0, %v275_v1 }
   0x2   :  { %233 = vmatpush3.bf16.msra.mxu0 %v248_v0  ;;  %v96_v3 = vld [vmem:[%s355_s1] sm:$0xff]  ;;  %246 = vset.pattern.permute.xlu0 %v277_v4 }
   0x3   :  { %234 = vmatprep.subr.bf16.mxu0 %v275_v1  ;;  %247 = vset.pattern.permute.xlu1 %v277_v4 }
   0x4   :  { %9 = vsyncpa [#allocation4], 0  ;;  %v250_v5 = vld [vmem:[%s356_s2] sm:$0xff]   ;;  %105 = vperm.xlu0 %246, %v96_v3   ;;  %vm49_vm1 = vcmask 261120   ;;  %v97_v7 = vld [vmem:[%s355_s1 + $0x8] sm:$0xff]  ;;  %v98_v8 = vlaneseq  ;;  %vm23_vm11 = vcmask 7168  }
   0x5   :  { %v94_v6 = vld [vmem:[%s354_s0] sm:$0xff]  ;;  %24 = vst.msk [vmem:[#allocation2] sm:$0xff] %vm23_vm11, %v277_v4  ;;  %25 = vst.msk [vmem:[#allocation2 + $0x8] sm:$0xff] %vm23_vm11, %v277_v4  ;;  %v95_v21 = vld [vmem:[%s354_s0 + $0x8] sm:$0xff]  ;;  %s278_s0 = smov [#allocation3]  }
   0x6   :  { %235 = vmatpush3.bf16.msra.mxu0 %v249_v2  ;;  %v99_v10 = vand.u32 127, %v98_v8  ;;  %s217_s26 = sshll.u32 %s278_s0, 4  ;;  %s218_s26 = int_to_ptr.vmem [resolvable:$true] %s217_s26 }
   0x7   :  { %s251_s28 = scalar_lea.vmem %s218_s26, 128  ;;  %p256_p1 = scmp.lt.s32.totalorder %s218_s26, %s218_s26 }
   0x8   :  { %118 = vperm.xlu0 %246, %v94_v6   ;;  %vm133_vm6 = vcmp.lt.s32.totalorder %v99_v10, 16  ;;  %p252_p0 = scmp.ne.s32.totalorder %s218_s26, %s251_s28  ;;  %p257_p2 = scmp.lt.s32.totalorder %s251_s28, %s251_s28 }
   0x9   :  { %237 = vmatmul.mubr.msk.bf16.vlgmr.msra.gmra.mrb[0].mxu0 %vm49_vm1, %v250_v5 }
   0xa   :  { %p258_p3 = por %p257_p2, %p256_p1 }
   0xc   :  { %110 = vperm.xlu0 %246, %v97_v7   ;;  %v136_v27 = vld [vmem:[#allocation2] sm:$0xff]  ;;  %v137_v49 = vld [vmem:[#allocation2 + $0x8] sm:$0xff]  ;;  %p259_p4 = pnand %p258_p3, %p252_p0 }
  0x83   :  { %v106_v9 = vpop.permute.xlu0 %105 }
  0x87   :  { %v119_v11 = vpop.permute.xlu0 %118 }
  0x88   :  { %vm123_vm2 = vcmp.lt.s32.totalorder %v99_v10, %v119_v11  ;;  %vm129_vm7 = vcmp.ne.s32.totalorder %v99_v10, %v119_v11 }
  0x8b   :  { %v111_v29 = vpop.permute.xlu0 %110 }
  0xdc   :  { %v87_v12 = vpop.f32.mrb[0].mxu0 }
  0xdd   :  { %vm113_vm3 = vcmp.gt.f32.partialorder %v87_v12, %v106_v9  ;;  %vm115_vm4 = vcmp.eq.f32.partialorder %v87_v12, %v106_v9  ;;  %v238_v13 = vpop.f32.mrb[1].mxu0 }
  0xde   :  { %vm125_vm5 = vmand %vm115_vm4, %vm123_vm2  ;;  %v90_v14 = vpop.f32.mrb[2].mxu0  ;;  %vm181_vm4 = vcmp.ge.s32.totalorder %v94_v6, 0 }
  0xdf   :  { %vm127_vm8 = vmor %vm113_vm3, %vm125_vm5  ;;  %v239_v15 = vpop.f32.mrb[3].mxu0  ;;  %vm116_vm12 = vcmp.eq.f32.partialorder %v90_v14, %v111_v29  ;;  %vm114_vm15 = vcmp.gt.f32.partialorder %v90_v14, %v111_v29  ;;  %vm185_vm5 = vcmp.lt.s32.totalorder %v94_v6, 16 }
  0xe0   :  { %vm131_vm9 = vmand %vm127_vm8, %vm129_vm7 }
  0xe1   :  { %vm134_vm10 = vmand %vm131_vm9, %vm133_vm6 }
  0xe2   :  { %v138_v16 = vsel %vm134_vm10, 1, %v277_v4  ;;  %vm187_vm7 = vmand %vm181_vm4, %vm185_vm5 }
  0xe3   :  { %v141_v17 = vshrl.u32 %v138_v16, 16  ;;  %v140_v19 = vand.u32 65535, %v138_v16 }
  0xe5   :  { %v143_v18 = vcvt.s32.f32 %v141_v17  ;;  %v142_v20 = vcvt.s32.f32 %v140_v19 }
  0xe7   :  { %146 = vadd.xlane.f32.xlu1 %v143_v18 }
  0xeb   :  { %144 = vadd.xlane.f32.xlu1 %v142_v20 }
  0xfc   :  { %121 = vperm.xlu1 %247, %v95_v21  }
 0x174   :  { %v147_v22 = vpop.xlane.xlu1 %146 }
 0x175   :  { %v149_v23 = vcvt.f32.s32 %v147_v22 }
 0x177   :  { %v150_v25 = vshll.u32 %v149_v23, 16 }
 0x178   :  { %v145_v24 = vpop.xlane.xlu1 %144 }
 0x179   :  { %v148_v26 = vcvt.f32.s32 %v145_v24 }
 0x17b   :  { %v151_v28 = vadd.s32 %v150_v25, %v148_v26 }
 0x17c   :  { %v122_v30 = vpop.permute.xlu1 %121 }
 0x17d   :  { %v164_v31 = vadd.s32 %v151_v28, %v136_v27  ;;  %vm124_vm13 = vcmp.lt.s32.totalorder %v99_v10, %v122_v30  ;;  %vm130_vm14 = vcmp.ne.s32.totalorder %v99_v10, %v122_v30 }
 0x17e   :  { %vm126_vm0 = vmand %vm116_vm12, %vm124_vm13 }
 0x17f   :  { %167 = vst.msk [vmem:[#allocation2] sm:$0xff] %vm23_vm11, %v164_v31  ;;  %vm128_vm1 = vmor %vm114_vm15, %vm126_vm0 }
 0x180   :  { %vm132_vm2 = vmand %vm128_vm1, %vm130_vm14 }
 0x181   :  { %vm135_vm3 = vmand %vm132_vm2, %vm133_vm6 }
 0x182   :  { %v139_v32 = vsel %vm135_vm3, 1, %v277_v4 }
 0x183   :  { %v153_v33 = vshrl.u32 %v139_v32, 16  ;;  %v152_v37 = vand.u32 65535, %v139_v32 }
 0x185   :  { %v155_v34 = vcvt.s32.f32 %v153_v33  ;;  %v154_v39 = vcvt.s32.f32 %v152_v37 }
 0x186   :  { %v189_v35 = vld [vmem:[#allocation2] sm:$0xff] }
 0x187   :  { %158 = vadd.xlane.f32.xlu1 %v155_v34  ;;  %vm191_vm8 = vcmp.lt.s32.totalorder %v189_v35, 5 }
 0x188   :  { %vm193_vm9 = vmand %vm187_vm7, %vm191_vm8 }
 0x189   :  { %v195_v36 = vsel %vm193_vm9, 1.0, %v275_v1 }
 0x18a   :  { %v197_v38 = vsel %vm23_vm11, %v195_v36, 0.0 }
 0x18b   :  { %200 = vadd.xlane.f32.xlu0 %v197_v38 }
 0x18f   :  { %156 = vadd.xlane.f32.xlu0 %v154_v39 }
 0x214   :  { %v159_v40 = vpop.xlane.xlu1 %158 }
 0x215   :  { %v161_v42 = vcvt.f32.s32 %v159_v40 }
 0x217   :  { %v162_v46 = vshll.u32 %v161_v42, 16 }
 0x218   :  { %v201_v41 = vpop.xlane.xlu0 %200 }
 0x219   :  { %v202_v43 = vrot.slane %v201_v41, 4 }
 0x21b   :  { %v203_v44 = vadd.f32 %v202_v43, %v201_v41 }
 0x21c   :  { %v157_v45 = vpop.xlane.xlu0 %156 }
 0x21d   :  { %v204_v47 = vrot.slane %v203_v44, 2  ;;  %v160_v48 = vcvt.f32.s32 %v157_v45 }
 0x21f   :  { %v163_v50 = vadd.s32 %v162_v46, %v160_v48  ;;  %v205_v51 = vadd.f32 %v204_v47, %v203_v44 }
 0x221   :  { %v165_v52 = vadd.s32 %v163_v50, %v137_v49  ;;  %v206_v53 = vrot.slane %v205_v51, 1 }
 0x223   :  { %168 = vst.msk [vmem:[#allocation2 + $0x8] sm:$0xff] %vm23_vm11, %v165_v52  ;;  %v207_v54 = vadd.f32 %v206_v53, %v205_v51 }
 0x225   :  { %240 = vpush %v207_v54 }
 0x256   :  { %s241_s27 = spop %240 }
 0x257   :  { %v209_v55 = vstv %s241_s27 }
 0x258   :  { %210 = vst [vmem:[#allocation3] sm:$0xff] %v209_v55 }
 0x259   :  { %262 = shalt.err (!%p259_p4)
}
 0x25a   :  { %s263_s5 = scalar_lea.hbm %s358_s4, 128 }
 0x25b   :  { %p264_p5 = scmp.ne.s32.totalorder %s358_s4, %s263_s5  ;;  %p267_p6 = scmp.lt.u32.totalorder %s263_s5, %s358_s4 }
 0x25d   :  { %p269_p7 = pnand %p267_p6, %p264_p5 }
 0x25f   :  { %272 = shalt.err (!%p269_p7)
}
 0x260   :  { %220 = dma.vmem_to_hbm [thread:$0]  %s218_s26, 128, %s358_s4, [#allocation4]  }
 0x261   :  { %273 = dma.done.wait [#allocation4], 128  }
 0x262   :  { %274 = vsyncadd [#allocation4], 4294967168 }
 0x263   :  { %224 = vsyncpa [#allocation4], 1 }

</bundles_post_ra>
